<compile_context>
chip_gen: v5e
topology: v5e:2x2
jax: 0.10.0
libtpu: 0.0.40
codegen_flags: <defaults>
</compile_context>

<pallas_src>
import jax
import jax.numpy as jnp
from jax.experimental import pallas as pl
from jax.experimental.pallas import tpu as pltpu


def _round_up(n: int, m: int) -> int:
    return ((n + m - 1) // m) * m


def _mlp_kernel(x_ref, w1_ref, b1_ref, w2_ref, b2_ref, o_ref):
    # x/w1/w2 are bf16 (MXU-native), biases are f32, accumulation in f32.
    x = x_ref[...]                                                   # [tm, in_p] bf16
    h = jnp.dot(x, w1_ref[...], preferred_element_type=jnp.float32)  # f32 acc
    h = jnp.maximum(h + b1_ref[...], 0.0)                            # bias + ReLU in f32
    h = h.astype(w2_ref.dtype)                                       # bf16 for 2nd MXU pass
    y = jnp.dot(h, w2_ref[...], preferred_element_type=jnp.float32) + b2_ref[...]
    o_ref[...] = y.astype(o_ref.dtype)


def lin_fuse_forward(x, w1, b1, w2, b2, *, tm: int = 512):
    """x: [B, input_dim]; w1: [input_dim, hidden]; b1: [1, hidden];
    w2: [hidden, output_dim]; b2: [1, output_dim]."""
    B, in_dim = x.shape
    hid_dim = w1.shape[1]
    out_dim = w2.shape[1]
    out_dtype = x.dtype

    # Lane-dense padding (multiples of 128 on feature axes, 8 on batch tiles).
    in_p = _round_up(in_dim, 128)
    hid_p = _round_up(hid_dim, 128)
    out_p = _round_up(out_dim, 128)

    tm = min(tm, _round_up(B, 8))          # don't over-pad tiny batches
    B_p = _round_up(B, tm)

    # Pad + cast once in the wrapper (bf16 matmul operands halve DMA bytes;
    # zero padding is exact: extra hidden cols -> ReLU(0)=0, extra w2 rows -> 0).
    xp = jnp.zeros((B_p, in_p), jnp.bfloat16).at[:B, :in_dim].set(x.astype(jnp.bfloat16))
    w1p = jnp.zeros((in_p, hid_p), jnp.bfloat16).at[:in_dim, :hid_dim].set(w1.astype(jnp.bfloat16))
    b1p = jnp.zeros((1, hid_p), jnp.float32).at[:, :hid_dim].set(b1.astype(jnp.float32))
    w2p = jnp.zeros((hid_p, out_p), jnp.bfloat16).at[:hid_dim, :out_dim].set(w2.astype(jnp.bfloat16))
    b2p = jnp.zeros((1, out_p), jnp.float32).at[:, :out_dim].set(b2.astype(jnp.float32))

    grid = (B_p // tm,)
    out_padded = pl.pallas_call(
        _mlp_kernel,
        out_shape=jax.ShapeDtypeStruct((B_p, out_p), jnp.float32),
        grid_spec=pltpu.PrefetchScalarGridSpec(
            num_scalar_prefetch=0,
            grid=grid,
            in_specs=[
                pl.BlockSpec((tm, in_p), lambda i: (i, 0)),     # activations stream
                pl.BlockSpec((in_p, hid_p), lambda i: (0, 0)),  # weights resident
                pl.BlockSpec((1, hid_p), lambda i: (0, 0)),
                pl.BlockSpec((hid_p, out_p), lambda i: (0, 0)),
                pl.BlockSpec((1, out_p), lambda i: (0, 0)),
            ],
            out_specs=pl.BlockSpec((tm, out_p), lambda i: (i, 0)),
        ),
        compiler_params=pltpu.CompilerParams(
            dimension_semantics=("parallel",),        # shard batch across v7x's 2 TCs
            vmem_limit_bytes=64 * 1024 * 1024,        # sized against v7x VMEM
        ),
    )(xp, w1p, b1p, w2p, b2p)

    return out_padded[:B, :out_dim].astype(out_dtype)


def init_linear(key, in_dim, out_dim, dtype=jnp.float32):
    # Deterministic init mimicking torch.nn.Linear (uniform +- 1/sqrt(in_dim)).
    kw, kb = jax.random.split(key)
    bound = 1.0 / (in_dim ** 0.5)
    w = jax.random.uniform(kw, (in_dim, out_dim), dtype, -bound, bound)
    b = jax.random.uniform(kb, (1, out_dim), dtype, -bound, bound)
    return w, b


if __name__ == "__main__":
    key = jax.random.PRNGKey(0)
    k_x, k_l1, k_l2 = jax.random.split(key, 3)

    # LinFuseModel(input_dim_1=32, output_dim=16, conf=Config.PRE,
    #              n_layers=2, drop_out=0.0, hidden_dim=-1)
    batch = 8
    input_dim = 32           # input_dim_1 (use_fuse=False, use_model=True)
    hidden_dim = input_dim   # hidden_dim == -1 -> input_dim
    output_dim = 16

    x = jax.random.normal(k_x, (batch, input_dim), jnp.float32)
    w1, b1 = init_linear(k_l1, input_dim, hidden_dim)
    w2, b2 = init_linear(k_l2, hidden_dim, output_dim)

    out = lin_fuse_forward(x, w1, b1, w2, b2)
    jax.block_until_ready(out)
    assert out.shape == (batch, output_dim)
    assert out.dtype == x.dtype

    # Reference mirroring the kernel's numerics (bf16 MXU operands, f32 accumulate).
    xb, w1b, w2b = (a.astype(jnp.bfloat16) for a in (x, w1, w2))
    h_ref = jnp.maximum(
        jnp.dot(xb, w1b, preferred_element_type=jnp.float32) + b1.astype(jnp.float32), 0.0
    ).astype(jnp.bfloat16)
    ref = jnp.dot(h_ref, w2b, preferred_element_type=jnp.float32) + b2.astype(jnp.float32)
    assert jnp.allclose(out, ref, atol=1e-4, rtol=1e-4)

    # Loose sanity check against the pure-f32 math (bf16 rounding tolerance).
    ref_f32 = jnp.maximum(x @ w1 + b1, 0.0) @ w2 + b2
    assert jnp.allclose(out, ref_f32, atol=5e-2, rtol=5e-2)

    print("KERNEL_OK")
</pallas_src>

<mosaic_0001>
module attributes {stable_mosaic.version = 11 : i64} {
  func.func @_mlp_kernel(%arg0: i32, %arg1: memref<8x128xbf16, #tpu.memory_space<vmem>>, %arg2: memref<128x128xbf16, #tpu.memory_space<vmem>>, %arg3: memref<1x128xf32, #tpu.memory_space<vmem>>, %arg4: memref<128x128xbf16, #tpu.memory_space<vmem>>, %arg5: memref<1x128xf32, #tpu.memory_space<vmem>>, %arg6: memref<8x128xf32, #tpu.memory_space<vmem>>) attributes {dimension_semantics = [#tpu.dimension_semantics<parallel>], iteration_bounds = array<i64: 1>, scalar_prefetch = 0 : i64, scratch_operands = 0 : i64, tpu.core_type = #tpu.core_type<tc>, window_params = [{transform_indices = @transform_0, window_bounds = array<i64: 8, 128>}, {pipeline_mode = #tpu.pipeline_mode<synchronous>, transform_indices = @transform_1, window_bounds = array<i64: 128, 128>}, {pipeline_mode = #tpu.pipeline_mode<synchronous>, transform_indices = @transform_2, window_bounds = array<i64: 1, 128>}, {pipeline_mode = #tpu.pipeline_mode<synchronous>, transform_indices = @transform_3, window_bounds = array<i64: 128, 128>}, {pipeline_mode = #tpu.pipeline_mode<synchronous>, transform_indices = @transform_4, window_bounds = array<i64: 1, 128>}, {transform_indices = @transform_5, window_bounds = array<i64: 8, 128>}]} {
    %c0 = arith.constant 0 : index
    %c0_0 = arith.constant 0 : index
    %0 = vector.load %arg1[%c0, %c0_0] : memref<8x128xbf16, #tpu.memory_space<vmem>>, vector<8x128xbf16>
    %c0_1 = arith.constant 0 : index
    %c0_2 = arith.constant 0 : index
    %1 = vector.load %arg2[%c0_1, %c0_2] : memref<128x128xbf16, #tpu.memory_space<vmem>>, vector<128x128xbf16>
    %cst = arith.constant dense<0.000000e+00> : vector<8x128xf32>
    %2 = tpu.matmul %0, %1, %cst {dimension_numbers = #tpu.dot_dimension_numbers<[1], [0], [0], [1], [0, 0, 1, 1], [], []>} : vector<8x128xbf16>, vector<128x128xbf16>, vector<8x128xf32> -> vector<8x128xf32>
    %c0_3 = arith.constant 0 : index
    %c0_4 = arith.constant 0 : index
    %3 = vector.load %arg3[%c0_3, %c0_4] : memref<1x128xf32, #tpu.memory_space<vmem>>, vector<1x128xf32>
    %4 = vector.broadcast %3 : vector<1x128xf32> to vector<8x128xf32>
    %5 = arith.addf %2, %4 : vector<8x128xf32>
    %cst_5 = arith.constant 0.000000e+00 : f32
    %6 = vector.broadcast %cst_5 : f32 to vector<8x128xf32>
    %7 = arith.maximumf %5, %6 : vector<8x128xf32>
    %8 = arith.truncf %7 : vector<8x128xf32> to vector<8x128xbf16>
    %c0_6 = arith.constant 0 : index
    %c0_7 = arith.constant 0 : index
    %9 = vector.load %arg4[%c0_6, %c0_7] : memref<128x128xbf16, #tpu.memory_space<vmem>>, vector<128x128xbf16>
    %cst_8 = arith.constant dense<0.000000e+00> : vector<8x128xf32>
    %10 = tpu.matmul %8, %9, %cst_8 {dimension_numbers = #tpu.dot_dimension_numbers<[1], [0], [0], [1], [0, 0, 1, 1], [], []>} : vector<8x128xbf16>, vector<128x128xbf16>, vector<8x128xf32> -> vector<8x128xf32>
    %c0_9 = arith.constant 0 : index
    %c0_10 = arith.constant 0 : index
    %11 = vector.load %arg5[%c0_9, %c0_10] : memref<1x128xf32, #tpu.memory_space<vmem>>, vector<1x128xf32>
    %12 = vector.broadcast %11 : vector<1x128xf32> to vector<8x128xf32>
    %13 = arith.addf %10, %12 : vector<8x128xf32>
    %c0_11 = arith.constant 0 : index
    %c0_12 = arith.constant 0 : index
    %14 = vector.load %arg6[%c0_11, %c0_12] : memref<8x128xf32, #tpu.memory_space<vmem>>, vector<8x128xf32>
    tpu.vector_store %arg6[%c0_11, %c0_12], %13 {strides = array<i32>} : memref<8x128xf32, #tpu.memory_space<vmem>>, vector<8x128xf32>,
    return
  }
  func.func @transform_0(%arg0: i32) -> (i32, i32) {
    %c0_i32 = arith.constant 0 : i32
    %c0_i32_0 = arith.constant 0 : i32
    return %arg0, %c0_i32 : i32, i32
  }
  func.func @transform_1(%arg0: i32) -> (i32, i32) {
    %c0_i32 = arith.constant 0 : i32
    %c0_i32_0 = arith.constant 0 : i32
    %c0_i32_1 = arith.constant 0 : i32
    return %c0_i32, %c0_i32_0 : i32, i32
  }
  func.func @transform_2(%arg0: i32) -> (i32, i32) {
    %c0_i32 = arith.constant 0 : i32
    %c0_i32_0 = arith.constant 0 : i32
    %c0_i32_1 = arith.constant 0 : i32
    return %c0_i32, %c0_i32_0 : i32, i32
  }
  func.func @transform_3(%arg0: i32) -> (i32, i32) {
    %c0_i32 = arith.constant 0 : i32
    %c0_i32_0 = arith.constant 0 : i32
    %c0_i32_1 = arith.constant 0 : i32
    return %c0_i32, %c0_i32_0 : i32, i32
  }
  func.func @transform_4(%arg0: i32) -> (i32, i32) {
    %c0_i32 = arith.constant 0 : i32
    %c0_i32_0 = arith.constant 0 : i32
    %c0_i32_1 = arith.constant 0 : i32
    return %c0_i32, %c0_i32_0 : i32, i32
  }
  func.func @transform_5(%arg0: i32) -> (i32, i32) {
    %c0_i32 = arith.constant 0 : i32
    %c0_i32_0 = arith.constant 0 : i32
    return %arg0, %c0_i32 : i32, i32
  }
}

</mosaic_0001>

<bundles_post_ra>
// kernel: tpu_custom_call.1
= control target key start
LH: loop header
LB: loop body
LE: loop exit
PB: predicated region body
PF: predicated region fallthrough
CT: control target
= control target key end

     0   :  { %10 = vsyncpa [#allocation3], 0  ;;  %s494_s0 = inlined_call_operand.hbm [shape: bf16[8,128], index: 0, kind: input, shape index: {}]   ;;  %s495_s1 = inlined_call_operand.hbm [shape: bf16[128,128], index: 1, kind: input, shape index: {}]   ;;  %s496_s2 = inlined_call_operand.vmem [shape: f32[1,128], index: 2, kind: input, shape index: {}]   ;;  %s497_s3 = inlined_call_operand.hbm [shape: bf16[128,128], index: 3, kind: input, shape index: {}]   ;;  %s498_s4 = inlined_call_operand.vmem [shape: f32[1,128], index: 4, kind: input, shape index: {}]   ;;  %s499_s5 = inlined_call_operand.hbm [shape: f32[8,128], index: 5, kind: output, shape index: {}]  }
   0x1   :  { %11 = vsyncpa [#allocation6], 0  ;;  %s28_s20 = sshll.u32 %s495_s1, 4  ;;  %s29_s20 = int_to_ptr.hbm [resolvable:$true] %s28_s20 }
   0x2   :  { %12 = vsyncpa [#allocation4], 0  ;;  %s440_s21 = smov [#allocation5]   ;;  %s18_s25 = sshll.u32 %s494_s0, 4  ;;  %s19_s25 = int_to_ptr.hbm [resolvable:$true] %s18_s25 }
   0x3   :  { %s30_s22 = sshll.u32 %s440_s21, 4  ;;  %s441_s26 = smov 64   ;;  %s31_s22 = int_to_ptr.vmem [resolvable:$true] %s30_s22 }
   0x4   :  { %s442_s27 = smov 4   ;;  %s443_s28 = smov [#allocation2]  }
   0x5   :  { %36 = dma.hbm_to_vmem [thread:$0]  %s29_s20, 1024, %s31_s22, [#allocation6], %s441_s26, %s441_s26, %s442_s27  }
   0x6   :  { %s20_s29 = sshll.u32 %s443_s28, 4  ;;  %s43_s7 = sshll.u32 %s497_s3, 4  ;;  %s21_s29 = int_to_ptr.vmem [resolvable:$true] %s20_s29  ;;  %s44_s7 = int_to_ptr.hbm [resolvable:$true] %s43_s7 }
   0x7   :  { %23 = dma.hbm_to_vmem [thread:$0]  %s19_s25, 64, %s21_s29, [#allocation3]  }
   0x8   :  { %s444_s1 = smov [#allocation7]  }
   0x9   :  { %s45_s8 = sshll.u32 %s444_s1, 4  ;;  %s46_s8 = int_to_ptr.vmem [resolvable:$true] %s45_s8 }
   0xa   :  { %51 = dma.hbm_to_vmem [thread:$0]  %s44_s7, 1024, %s46_s8, [#allocation6], %s441_s26, %s441_s26, %s442_s27  }
   0xb   :  { %434 = dma.done.wait [#allocation3], 64  }
   0xc   :  { %435 = vsyncadd [#allocation3], 4294967232 }
   0xd   :  { %436 = dma.done.wait [#allocation6], 2048  }
   0xe   :  { %437 = vsyncadd [#allocation6], 4294965248  ;;  %v321_v0 = vld [vmem:[#allocation5 + $0x38] sm:$0xff]  ;;  %v320_v1 = vld [vmem:[#allocation5 + $0x30] sm:$0xff]  ;;  %s445_s11 = smov [#allocation8]   ;;  %s239_s15 = sshll.u32 %s499_s5, 4  ;;  %s240_s15 = int_to_ptr.hbm [resolvable:$true] %s239_s15 }
   0xf   :  { %135 = vmatpush.bf16.msra.mxu0 %v321_v0  ;;  %v329_v2 = vld [vmem:[#allocation7 + $0x38] sm:$0xff]  ;;  %v328_v3 = vld [vmem:[#allocation7 + $0x30] sm:$0xff]  ;;  %v319_v4 = vld [vmem:[#allocation5 + $0x28] sm:$0xff]  ;;  %s237_s12 = sshll.u32 %s445_s11, 4  ;;  %s238_s12 = int_to_ptr.vmem [resolvable:$true] %s237_s12 }
  0x10   :  { %218 = vmatpush.bf16.msra.mxu1 %v329_v2  ;;  %v327_v5 = vld [vmem:[#allocation7 + $0x28] sm:$0xff]  ;;  %v318_v6 = vld [vmem:[#allocation5 + $0x20] sm:$0xff]  ;;  %v317_v8 = vld [vmem:[#allocation5 + $0x18] sm:$0xff] }
  0x11   :  { %v326_v7 = vld [vmem:[#allocation7 + $0x20] sm:$0xff]  ;;  %v325_v9 = vld [vmem:[#allocation7 + $0x18] sm:$0xff]  ;;  %v316_v10 = vld [vmem:[#allocation5 + $0x10] sm:$0xff] }
  0x12   :  { %v324_v11 = vld [vmem:[#allocation7 + $0x10] sm:$0xff]  ;;  %v315_v12 = vld [vmem:[#allocation5 + $0x8] sm:$0xff]  ;;  %v314_v13 = vld [vmem:[#allocation5] sm:$0xff] }
  0x13   :  { %136 = vmatpush.bf16.msra.mxu0 %v320_v1  ;;  %v66_v14 = vld [vmem:[#allocation2] sm:$0xf]  ;;  %v323_v15 = vld [vmem:[#allocation7 + $0x8] sm:$0xff]  ;;  %v322_v16 = vld [vmem:[#allocation7] sm:$0xff] }
  0x14   :  { %219 = vmatpush.bf16.msra.mxu1 %v328_v3  ;;  %v336_v17 = vld [vmem:[%s496_s2] ss:$0 sm:$0xff] }
  0x15   :  { %v337_v23 = vld [vmem:[%s498_s4] ss:$0 sm:$0xff] }
  0x17   :  { %137 = vmatpush.bf16.msra.mxu0 %v319_v4 }
  0x18   :  { %220 = vmatpush.bf16.msra.mxu1 %v327_v5 }
  0x1b   :  { %138 = vmatpush.bf16.msra.mxu0 %v318_v6 }
  0x1c   :  { %221 = vmatpush.bf16.msra.mxu1 %v326_v7 }
  0x1f   :  { %139 = vmatpush.bf16.msra.mxu0 %v317_v8 }
  0x20   :  { %222 = vmatpush.bf16.msra.mxu1 %v325_v9 }
  0x23   :  { %140 = vmatpush.bf16.msra.mxu0 %v316_v10 }
  0x24   :  { %223 = vmatpush.bf16.msra.mxu1 %v324_v11 }
  0x27   :  { %141 = vmatpush.bf16.msra.mxu0 %v315_v12 }
  0x28   :  { %224 = vmatpush.bf16.msra.mxu1 %v323_v15 }
  0x2b   :  { %142 = vmatpush.bf16.msra.mxu0 %v314_v13 }
  0x2c   :  { %225 = vmatpush.bf16.msra.mxu1 %v322_v16 }
  0x2e   :  { %143 = vmatmul.bf16.vlgmr.msra.gmra.mxu0 %v66_v14 }
  0xab   :  { %v144_v18 = vpop.f32.mrf.mxu0 }
  0xac   :  { %v145_v19 = vadd.f32 %v336_v17, %v144_v18 }
  0xae   :  { %v148_v20 = vmax.f32 %v145_v19, 0.0 }
  0xb0   :  { %v149_v21 = vpack.c.bf16 %v148_v20, %v148_v20 }
  0xb2   :  { %226 = vmatmul.bf16.vlgmr.msra.gmra.mxu1 %v149_v21 }
  0xb3   :  { %v146_v22 = vpop.f32.mrf.mxu0 }
 0x12f   :  { %v227_v24 = vpop.f32.mrf.mxu1 }
 0x130   :  { %v228_v25 = vadd.f32 %v337_v23, %v227_v24 }
 0x132   :  { %231 = vst [vmem:[#allocation8] sm:$0xff] %v228_v25 }
 0x133   :  { %242 = dma.vmem_to_hbm [thread:$0]  %s238_s12, 128, %s240_s15, [#allocation4]  }
 0x137   :  { %v229_v26 = vpop.f32.mrf.mxu1 }
 0x138   :  { %438 = dma.done.wait [#allocation4], 128  }
 0x139   :  { %439 = vsyncadd [#allocation4], 4294967168 }
 0x13a   :  { %247 = vsyncpa [#allocation3], 1 }
 0x13b   :  { %248 = vsyncpa [#allocation6], 1 }
 0x13c   :  { %249 = vsyncpa [#allocation4], 1 }

</bundles_post_ra>
